<compile_context>
chip_gen: v7x
topology: tpu7x:2x2x1
jax: 0.10.0
libtpu: 0.0.40
codegen_flags: <defaults>
</compile_context>

<pallas_src>
import functools

import jax
import jax.numpy as jnp
from jax.experimental import pallas as pl
from jax.experimental.pallas import tpu as pltpu


def mlp_kernel(x_ref, w1_ref, b1_ref, w2_ref, b2_ref, w3_ref, b3_ref, o_ref):
    # Fused hot path: three MXU matmuls (f32 accumulation) + f32 bias/ReLU epilogue.
    x = x_ref[...].astype(w1_ref.dtype)          # cast-in-kernel: no extra HBM pass
    h = jnp.dot(x, w1_ref[...], preferred_element_type=jnp.float32) + b1_ref[...]
    h = jnp.maximum(h, 0.0)
    h = jnp.dot(h.astype(w2_ref.dtype), w2_ref[...],
                preferred_element_type=jnp.float32) + b2_ref[...]
    h = jnp.maximum(h, 0.0)
    h = jnp.dot(h.astype(w3_ref.dtype), w3_ref[...],
                preferred_element_type=jnp.float32) + b3_ref[...]
    o_ref[...] = jnp.maximum(h, 0.0).astype(o_ref.dtype)


def _round_up(n, m):
    return ((n + m - 1) // m) * m


def prepare_params(params, compute_dtype=jnp.float32):
    """One-time parameter prep (do NOT call inside the per-step jitted path).

    Only a dtype cast is needed -- no padding.  Biases stay f32 so the
    bias-add/ReLU epilogue is f32 on every TPU generation (incl. v5e).
    """
    return {
        "w1": params["w1"].astype(compute_dtype),
        "w2": params["w2"].astype(compute_dtype),
        "w3": params["w3"].astype(compute_dtype),
        "b1": params["b1"].astype(jnp.float32),
        "b2": params["b2"].astype(jnp.float32),
        "b3": params["b3"].astype(jnp.float32),
    }


def neural_net_forward(x, prepared, *, batch_tile=1024):
    """x: (B, input_size).  prepared: output of `prepare_params` (weights (in,out), biases (1,out))."""
    w1, b1 = prepared["w1"], prepared["b1"]
    w2, b2 = prepared["w2"], prepared["b2"]
    w3, b3 = prepared["w3"], prepared["b3"]

    B, in_dim = x.shape
    hid = w1.shape[1]
    ncls = w3.shape[1]

    # Batch tile: multiple of 16 (covers bf16 sublane packing) and capped so
    # the grid has >= 2 steps whenever B allows -- keeps both v7x TCs fed;
    # harmless on single-TC v5e/v6e.
    SUB = 16
    half = _round_up(max(-(-B // 2), 1), SUB)
    tile = max(min(_round_up(batch_tile, SUB), half), SUB)
    Bp = _round_up(B, tile)

    xp = x
    if Bp != B:
        # Zero padded rows are mathematically inert (their outputs are sliced off).
        xp = jnp.pad(xp, ((0, Bp - B), (0, 0)))

    grid = (Bp // tile,)

    w_item = jnp.dtype(w1.dtype).itemsize
    cost = pl.CostEstimate(
        flops=2 * Bp * (in_dim * hid + hid * hid + hid * ncls),
        transcendentals=0,
        bytes_accessed=(Bp * in_dim * x.dtype.itemsize
                        + (in_dim * hid + hid * hid + hid * ncls) * w_item
                        + (hid + hid + ncls) * 4
                        + Bp * ncls * 4),
    )

    out = pl.pallas_call(
        mlp_kernel,
        out_shape=jax.ShapeDtypeStruct((Bp, ncls), jnp.float32),
        grid_spec=pltpu.PrefetchScalarGridSpec(
            num_scalar_prefetch=0,
            grid=grid,
            in_specs=[
                # x tiled over batch; weights/biases whole-array VMEM-resident blocks
                # (block last dims equal the full array dims -> legal without padding).
                pl.BlockSpec((tile, in_dim), lambda i: (i, 0)),
                pl.BlockSpec((in_dim, hid), lambda i: (0, 0)),
                pl.BlockSpec((1, hid), lambda i: (0, 0)),
                pl.BlockSpec((hid, hid), lambda i: (0, 0)),
                pl.BlockSpec((1, hid), lambda i: (0, 0)),
                pl.BlockSpec((hid, ncls), lambda i: (0, 0)),
                pl.BlockSpec((1, ncls), lambda i: (0, 0)),
            ],
            # True num_classes width: 8x fewer output HBM bytes than padding to
            # 128 lanes and no post-kernel class-axis slice (HBM side stays
            # contiguous; only the in-VMEM store is lane-masked).
            out_specs=pl.BlockSpec((tile, ncls), lambda i: (i, 0)),
        ),
        compiler_params=pltpu.CompilerParams(
            dimension_semantics=("parallel",),
        ),
        cost_estimate=cost,
    )(xp, w1, b1, w2, b2, w3, b3)

    if Bp != B:
        out = out[:B]
    return out


def init_params(key, input_size, hidden_size, num_classes):
    """Mirrors PyTorch nn.Linear default init U(-1/sqrt(fan_in), 1/sqrt(fan_in))."""
    def linear_init(k, fan_in, fan_out):
        kw, kb = jax.random.split(k)
        bound = 1.0 / jnp.sqrt(fan_in)
        # Stored as (in, out) so the kernel does x @ W (PyTorch weight is (out, in)).
        w = jax.random.uniform(kw, (fan_in, fan_out), jnp.float32, -bound, bound)
        b = jax.random.uniform(kb, (1, fan_out), jnp.float32, -bound, bound)
        return w, b

    k1, k2, k3 = jax.random.split(key, 3)
    w1, b1 = linear_init(k1, input_size, hidden_size)
    w2, b2 = linear_init(k2, hidden_size, hidden_size)
    w3, b3 = linear_init(k3, hidden_size, num_classes)
    return {"w1": w1, "b1": b1, "w2": w2, "b2": b2, "w3": w3, "b3": b3}


def reference_forward(x, p):
    h = jnp.maximum(x @ p["w1"] + p["b1"], 0.0)
    h = jnp.maximum(h @ p["w2"] + p["b2"], 0.0)
    return jnp.maximum(h @ p["w3"] + p["b3"], 0.0)


if __name__ == "__main__":
    key = jax.random.PRNGKey(0)
    k_x, k_p = jax.random.split(key)

    batch, input_size, hidden_size, num_classes = 512, 32, 32, 16
    x = jax.random.normal(k_x, (batch, input_size), jnp.float32)
    params = init_params(k_p, input_size, hidden_size, num_classes)
    ref = reference_forward(x, params)

    fwd = jax.jit(functools.partial(neural_net_forward, batch_tile=1024))

    # f32 matmul path: bitwise-close to the reference.
    p_f32 = prepare_params(params, jnp.float32)      # one-time prep, outside jit path
    out_f32 = jax.block_until_ready(fwd(x, p_f32))
    assert out_f32.shape == (batch, num_classes)
    assert jnp.allclose(out_f32, ref, atol=1e-5, rtol=1e-5), "f32 mismatch vs JAX reference"

    # bf16 matmul weights/activations (f32 accumulation) -- valid on v5e/v6e/v7x MXU.
    p_bf16 = prepare_params(params, jnp.bfloat16)
    out_bf16 = jax.block_until_ready(fwd(x, p_bf16))
    assert out_bf16.shape == (batch, num_classes)
    assert jnp.allclose(out_bf16, ref, atol=2e-2, rtol=2e-2), "bf16 mismatch vs JAX reference"

    # Ragged batch exercises the batch-pad + slice path.
    x_odd = x[:100]
    out_odd = jax.block_until_ready(fwd(x_odd, p_f32))
    assert out_odd.shape == (100, num_classes)
    assert jnp.allclose(out_odd, ref[:100], atol=1e-5, rtol=1e-5), "ragged-batch mismatch"

    print("KERNEL_OK")
</pallas_src>

<mosaic_0001>
module attributes {stable_mosaic.version = 11 : i64} {
  func.func @mlp_kernel(%arg0: i32, %arg1: memref<256x32xf32, #tpu.memory_space<vmem>>, %arg2: memref<32x32xf32, #tpu.memory_space<vmem>>, %arg3: memref<1x32xf32, #tpu.memory_space<vmem>>, %arg4: memref<32x32xf32, #tpu.memory_space<vmem>>, %arg5: memref<1x32xf32, #tpu.memory_space<vmem>>, %arg6: memref<32x16xf32, #tpu.memory_space<vmem>>, %arg7: memref<1x16xf32, #tpu.memory_space<vmem>>, %arg8: memref<256x16xf32, #tpu.memory_space<vmem>>) attributes {dimension_semantics = [#tpu.dimension_semantics<parallel>], iteration_bounds = array<i64: 2>, scalar_prefetch = 0 : i64, scratch_operands = 0 : i64, tpu.core_type = #tpu.core_type<tc>, window_params = [{transform_indices = @transform_0, window_bounds = array<i64: 256, 32>}, {pipeline_mode = #tpu.pipeline_mode<synchronous>, transform_indices = @transform_1, window_bounds = array<i64: 32, 32>}, {pipeline_mode = #tpu.pipeline_mode<synchronous>, transform_indices = @transform_2, window_bounds = array<i64: 1, 32>}, {pipeline_mode = #tpu.pipeline_mode<synchronous>, transform_indices = @transform_3, window_bounds = array<i64: 32, 32>}, {pipeline_mode = #tpu.pipeline_mode<synchronous>, transform_indices = @transform_4, window_bounds = array<i64: 1, 32>}, {pipeline_mode = #tpu.pipeline_mode<synchronous>, transform_indices = @transform_5, window_bounds = array<i64: 32, 16>}, {pipeline_mode = #tpu.pipeline_mode<synchronous>, transform_indices = @transform_6, window_bounds = array<i64: 1, 16>}, {transform_indices = @transform_7, window_bounds = array<i64: 256, 16>}]} {
    %c0 = arith.constant 0 : index
    %c0_0 = arith.constant 0 : index
    %0 = vector.load %arg1[%c0, %c0_0] : memref<256x32xf32, #tpu.memory_space<vmem>>, vector<256x32xf32>
    %c0_1 = arith.constant 0 : index
    %c0_2 = arith.constant 0 : index
    %1 = vector.load %arg2[%c0_1, %c0_2] : memref<32x32xf32, #tpu.memory_space<vmem>>, vector<32x32xf32>
    %cst = arith.constant dense<0.000000e+00> : vector<256x32xf32>
    %2 = tpu.matmul %0, %1, %cst {dimension_numbers = #tpu.dot_dimension_numbers<[1], [0], [0], [1], [0, 0, 1, 1], [], []>} : vector<256x32xf32>, vector<32x32xf32>, vector<256x32xf32> -> vector<256x32xf32>
    %c0_3 = arith.constant 0 : index
    %c0_4 = arith.constant 0 : index
    %3 = vector.load %arg3[%c0_3, %c0_4] : memref<1x32xf32, #tpu.memory_space<vmem>>, vector<1x32xf32>
    %4 = vector.broadcast %3 : vector<1x32xf32> to vector<256x32xf32>
    %5 = arith.addf %2, %4 : vector<256x32xf32>
    %cst_5 = arith.constant 0.000000e+00 : f32
    %6 = vector.broadcast %cst_5 : f32 to vector<256x32xf32>
    %7 = arith.maximumf %5, %6 : vector<256x32xf32>
    %c0_6 = arith.constant 0 : index
    %c0_7 = arith.constant 0 : index
    %8 = vector.load %arg4[%c0_6, %c0_7] : memref<32x32xf32, #tpu.memory_space<vmem>>, vector<32x32xf32>
    %cst_8 = arith.constant dense<0.000000e+00> : vector<256x32xf32>
    %9 = tpu.matmul %7, %8, %cst_8 {dimension_numbers = #tpu.dot_dimension_numbers<[1], [0], [0], [1], [0, 0, 1, 1], [], []>} : vector<256x32xf32>, vector<32x32xf32>, vector<256x32xf32> -> vector<256x32xf32>
    %c0_9 = arith.constant 0 : index
    %c0_10 = arith.constant 0 : index
    %10 = vector.load %arg5[%c0_9, %c0_10] : memref<1x32xf32, #tpu.memory_space<vmem>>, vector<1x32xf32>
    %11 = vector.broadcast %10 : vector<1x32xf32> to vector<256x32xf32>
    %12 = arith.addf %9, %11 : vector<256x32xf32>
    %cst_11 = arith.constant 0.000000e+00 : f32
    %13 = vector.broadcast %cst_11 : f32 to vector<256x32xf32>
    %14 = arith.maximumf %12, %13 : vector<256x32xf32>
    %c0_12 = arith.constant 0 : index
    %c0_13 = arith.constant 0 : index
    %15 = vector.load %arg6[%c0_12, %c0_13] : memref<32x16xf32, #tpu.memory_space<vmem>>, vector<32x16xf32>
    %cst_14 = arith.constant dense<0.000000e+00> : vector<256x16xf32>
    %16 = tpu.matmul %14, %15, %cst_14 {dimension_numbers = #tpu.dot_dimension_numbers<[1], [0], [0], [1], [0, 0, 1, 1], [], []>} : vector<256x32xf32>, vector<32x16xf32>, vector<256x16xf32> -> vector<256x16xf32>
    %c0_15 = arith.constant 0 : index
    %c0_16 = arith.constant 0 : index
    %17 = vector.load %arg7[%c0_15, %c0_16] : memref<1x16xf32, #tpu.memory_space<vmem>>, vector<1x16xf32>
    %18 = vector.broadcast %17 : vector<1x16xf32> to vector<256x16xf32>
    %19 = arith.addf %16, %18 : vector<256x16xf32>
    %cst_17 = arith.constant 0.000000e+00 : f32
    %20 = vector.broadcast %cst_17 : f32 to vector<256x16xf32>
    %21 = arith.maximumf %19, %20 : vector<256x16xf32>
    %c0_18 = arith.constant 0 : index
    %c0_19 = arith.constant 0 : index
    %22 = vector.load %arg8[%c0_18, %c0_19] : memref<256x16xf32, #tpu.memory_space<vmem>>, vector<256x16xf32>
    tpu.vector_store %arg8[%c0_18, %c0_19], %21 {strides = array<i32>} : memref<256x16xf32, #tpu.memory_space<vmem>>, vector<256x16xf32>,
    return
  }
  func.func @transform_0(%arg0: i32) -> (i32, i32) {
    %c0_i32 = arith.constant 0 : i32
    %c0_i32_0 = arith.constant 0 : i32
    return %arg0, %c0_i32 : i32, i32
  }
  func.func @transform_1(%arg0: i32) -> (i32, i32) {
    %c0_i32 = arith.constant 0 : i32
    %c0_i32_0 = arith.constant 0 : i32
    %c0_i32_1 = arith.constant 0 : i32
    return %c0_i32, %c0_i32_0 : i32, i32
  }
  func.func @transform_2(%arg0: i32) -> (i32, i32) {
    %c0_i32 = arith.constant 0 : i32
    %c0_i32_0 = arith.constant 0 : i32
    %c0_i32_1 = arith.constant 0 : i32
    return %c0_i32, %c0_i32_0 : i32, i32
  }
  func.func @transform_3(%arg0: i32) -> (i32, i32) {
    %c0_i32 = arith.constant 0 : i32
    %c0_i32_0 = arith.constant 0 : i32
    %c0_i32_1 = arith.constant 0 : i32
    return %c0_i32, %c0_i32_0 : i32, i32
  }
  func.func @transform_4(%arg0: i32) -> (i32, i32) {
    %c0_i32 = arith.constant 0 : i32
    %c0_i32_0 = arith.constant 0 : i32
    %c0_i32_1 = arith.constant 0 : i32
    return %c0_i32, %c0_i32_0 : i32, i32
  }
  func.func @transform_5(%arg0: i32) -> (i32, i32) {
    %c0_i32 = arith.constant 0 : i32
    %c0_i32_0 = arith.constant 0 : i32
    %c0_i32_1 = arith.constant 0 : i32
    return %c0_i32, %c0_i32_0 : i32, i32
  }
  func.func @transform_6(%arg0: i32) -> (i32, i32) {
    %c0_i32 = arith.constant 0 : i32
    %c0_i32_0 = arith.constant 0 : i32
    %c0_i32_1 = arith.constant 0 : i32
    return %c0_i32, %c0_i32_0 : i32, i32
  }
  func.func @transform_7(%arg0: i32) -> (i32, i32) {
    %c0_i32 = arith.constant 0 : i32
    %c0_i32_0 = arith.constant 0 : i32
    return %arg0, %c0_i32 : i32, i32
  }
}

</mosaic_0001>

<bundles_post_ra>
// kernel: neural_net_forward.1
= control target key start
LH: loop header
LB: loop body
LE: loop exit
PB: predicated region body
PF: predicated region fallthrough
CT: control target
= control target key end

     0   :  { %s1966_s24 = smov 0   ;;  %s2345_s0 = inlined_call_operand.vmem [shape: f32[512,32], index: 0, kind: input, shape index: {}]   ;;  %s2346_s1 = inlined_call_operand.vmem [shape: f32[32,32], index: 1, kind: input, shape index: {}]   ;;  %s2347_s2 = inlined_call_operand.vmem [shape: f32[1,32], index: 2, kind: input, shape index: {}]   ;;  %s2348_s3 = inlined_call_operand.vmem [shape: f32[32,32], index: 3, kind: input, shape index: {}]   ;;  %s2349_s4 = inlined_call_operand.vmem [shape: f32[1,32], index: 4, kind: input, shape index: {}]   ;;  %s2350_s5 = inlined_call_operand.vmem [shape: f32[32,16], index: 5, kind: input, shape index: {}]   ;;  %s2351_s6 = inlined_call_operand.vmem [shape: f32[1,16], index: 6, kind: input, shape index: {}]   ;;  %s2352_s7 = inlined_call_operand.vmem [shape: f32[512,16], index: 7, kind: output, shape index: {}]  }
   0x1 LB: > { %s1496_s25 = sadd.s32 4294967295, %s1924_s24   ;;  %p1500_p0 = scmp.ge.s32.totalorder %s1924_s24, 1  ;;  %s1924_s24 = sphi %s1966_s24, %s17_s24  }
   0x2   : > { %p238_p1 = scmp.lt.s32.totalorder %s1924_s24, 3 }
   0x4   : > { %p239_p2 = pnand %p1500_p0, %p238_p1 }
   0x5   : > { %v314_v0 = vld [vmem:[%s2346_s1] sm:$0xff] (!%p239_p2)  ;;  %v315_v1 = vld [vmem:[%s2346_s1 + $0x8] sm:$0xff] (!%p239_p2)  ;;  %v316_v2 = vld [vmem:[%s2346_s1 + $0x10] sm:$0xff] (!%p239_p2)  ;;  %s1501_s9 = sshll.u32 (!%p239_p2), %s1496_s25, 5  ;;  %vm325_vm0 = vcmask (!%p239_p2), 261120   ;;  %vm1407_vm1 = vcmask (!%p239_p2), 130048  }
   0x6   : > { %242 = sbr.rel (%p239_p2) target bundleno = 732 (0x2dc), region = 48  ;;  %v1882_v3 = vpack.c.bf16 (!%p239_p2), %v315_v1, %v314_v0  ;;  %v317_v4 = vld [vmem:[%s2346_s1 + $0x18] sm:$0xff] (!%p239_p2)  ;;  %p271_p3 = scmp.lt.s32.totalorder (!%p239_p2), %s1501_s9, 63  ;;  %v679_v6 = vld [vmem:[%s2348_s3] sm:$0xff] (!%p239_p2)  ;;  %v680_v7 = vld [vmem:[%s2348_s3 + $0x8] sm:$0xff] (!%p239_p2) }
   0x7   : > { %v1886_v5 = vpack.c.bf16 (!%p239_p2), %v317_v4, %v316_v2  ;;  %v1890_v8 = vpack.c.bf16 (!%p239_p2), %v680_v7, %v679_v6  ;;  %v681_v12 = vld [vmem:[%s2348_s3 + $0x10] sm:$0xff] (!%p239_p2)  ;;  %v682_v13 = vld [vmem:[%s2348_s3 + $0x18] sm:$0xff] (!%p239_p2)  ;;  %v1043_v44 = vld [vmem:[%s2350_s5] sm:$0xff] (!%p239_p2) }
   0x8   : > { %1883 = vmatprep.subr.bf16.mxu0 (!%p239_p2), %v1882_v3  ;;  %1906 = vmatprep.subr.bf16.mxu1 (!%p239_p2), %v1882_v3  ;;  %v1894_v19 = vpack.c.bf16 (!%p239_p2), %v682_v13, %v681_v12  ;;  %v1044_v45 = vld [vmem:[%s2350_s5 + $0x8] sm:$0xff] (!%p239_p2)  ;;  %v1045_v46 = vld [vmem:[%s2350_s5 + $0x10] sm:$0xff] (!%p239_p2)  ;;  %v1046_v48 = vld [vmem:[%s2350_s5 + $0x18] sm:$0xff] (!%p239_p2) }
   0x9   : > { %1885 = vmatpush3.bf16.msra.mxu0 (!%p239_p2), %v1882_v3  ;;  %1908 = vmatpush3.bf16.msra.mxu1 (!%p239_p2), %v1882_v3  ;;  %v1898_v47 = vpack.c.bf16 (!%p239_p2), %v1044_v45, %v1043_v44  ;;  %v1902_v49 = vpack.c.bf16 (!%p239_p2), %v1046_v48, %v1045_v46  ;;  %v2087_v50 = vld [vmem:[%s2347_s2] ss:$0 sm:$0xff] (!%p239_p2) }
   0xa   : > { %1887 = vmatprep.subr.bf16.mxu0 (!%p239_p2), %v1886_v5  ;;  %1907 = vmatprep.subr.bf16.mxu1 (!%p239_p2), %v1886_v5 }
   0xd   : > { %s2354_s9 = smov (!%p271_p3, %s1501_s9), 63  ;;  %1889 = vmatpush3.bf16.msra.mxu0 %v1886_v5  ;;  %1909 = vmatpush3.bf16.msra.mxu1 %v1886_v5 }
   0xe   : > { %s1502_s16 = sshll.u32 %s2354_s9, 3  ;;  %1891 = vmatprep.subr.bf16.mxu1 %v1890_v8  ;;  %1899 = vmatprep.subr.bf16.mxu0 %v1898_v47 }
   0xf   : > { %s2000_s19 = scalar_lea.vmem %s2345_s0, %s1502_s16  ;;  %s2245_s20 = scalar_lea.vmem %s2352_s7, %s1502_s16 }
  0x10   : > { %v282_v9 = vld [vmem:[%s2000_s19] sm:$0xff]  ;;  %v283_v10 = vld [vmem:[%s2000_s19 + $0x8] sm:$0xff]  ;;  %v284_v11 = vld [vmem:[%s2000_s19 + $0x10] sm:$0xff] }
  0x11   : > { %1722 = vmatprep.mubr.msk.f32.mxu0 %vm325_vm0, %v282_v9  ;;  %v285_v14 = vld [vmem:[%s2000_s19 + $0x18] sm:$0xff]  ;;  %v298_v15 = vld [vmem:[%s2000_s19 + $0x80] sm:$0xff]  ;;  %v299_v16 = vld [vmem:[%s2000_s19 + $0x88] sm:$0xff] }
  0x12   : > { %1723 = vmatmul.mubr.msk.f32.vlgmr.msra.gmra.mrb[0].mxu0 %vm325_vm0, %v283_v10  ;;  %v286_v17 = vld [vmem:[%s2000_s19 + $0x20] sm:$0xff]  ;;  %1746 = vmatprep.mubr.msk.f32.mxu1 %vm325_vm0, %v298_v15  ;;  %v300_v18 = vld [vmem:[%s2000_s19 + $0x90] sm:$0xff]  ;;  %v301_v20 = vld [vmem:[%s2000_s19 + $0x98] sm:$0xff] }
  0x13   : > { %1725 = vmatprep.mubr.msk.f32.mxu0 %vm325_vm0, %v284_v11  ;;  %1747 = vmatmul.mubr.msk.f32.vlgmr.msra.gmra.mrb[0].mxu1 %vm325_vm0, %v299_v16  ;;  %v287_v21 = vld [vmem:[%s2000_s19 + $0x28] sm:$0xff]  ;;  %v302_v22 = vld [vmem:[%s2000_s19 + $0xa0] sm:$0xff]  ;;  %v288_v23 = vld [vmem:[%s2000_s19 + $0x30] sm:$0xff] }
  0x14   : > { %1749 = vmatprep.mubr.msk.f32.mxu1 %vm325_vm0, %v300_v18  ;;  %1893 = vmatpush3.bf16.msra.mxu1 %v1890_v8  ;;  %v303_v24 = vld [vmem:[%s2000_s19 + $0xa8] sm:$0xff]  ;;  %v289_v25 = vld [vmem:[%s2000_s19 + $0x38] sm:$0xff]  ;;  %v304_v26 = vld [vmem:[%s2000_s19 + $0xb0] sm:$0xff] }
  0x15   : > { %1895 = vmatprep.subr.bf16.mxu1 %v1894_v19  ;;  %v290_v27 = vld [vmem:[%s2000_s19 + $0x40] sm:$0xff]  ;;  %v305_v28 = vld [vmem:[%s2000_s19 + $0xb8] sm:$0xff]  ;;  %v291_v29 = vld [vmem:[%s2000_s19 + $0x48] sm:$0xff]  ;;  %1901 = vmatpush3.bf16.msra.mxu0 %v1898_v47 }
  0x16   : > { %1726 = vmatmul.mubr.msk.f32.gmra.mrb[2].mxu0 %vm325_vm0, %v285_v14  ;;  %v306_v30 = vld [vmem:[%s2000_s19 + $0xc0] sm:$0xff]  ;;  %v292_v31 = vld [vmem:[%s2000_s19 + $0x50] sm:$0xff]  ;;  %v307_v32 = vld [vmem:[%s2000_s19 + $0xc8] sm:$0xff]  ;;  %1903 = vmatprep.subr.bf16.mxu0 %v1902_v49 }
  0x17   : > { %1728 = vmatprep.mubr.msk.f32.mxu0 %vm325_vm0, %v286_v17  ;;  %1750 = vmatmul.mubr.msk.f32.gmra.mrb[2].mxu1 %vm325_vm0, %v301_v20  ;;  %v293_v33 = vld [vmem:[%s2000_s19 + $0x58] sm:$0xff]  ;;  %v308_v34 = vld [vmem:[%s2000_s19 + $0xd0] sm:$0xff]  ;;  %v294_v35 = vld [vmem:[%s2000_s19 + $0x60] sm:$0xff] }
  0x18   : > { %1752 = vmatprep.mubr.msk.f32.mxu1 %vm325_vm0, %v302_v22  ;;  %1897 = vmatpush3.bf16.msra.mxu1 %v1894_v19  ;;  %v309_v36 = vld [vmem:[%s2000_s19 + $0xd8] sm:$0xff]  ;;  %v295_v37 = vld [vmem:[%s2000_s19 + $0x68] sm:$0xff]  ;;  %v310_v38 = vld [vmem:[%s2000_s19 + $0xe0] sm:$0xff] }
  0x19   : > { %v296_v39 = vld [vmem:[%s2000_s19 + $0x70] sm:$0xff]  ;;  %v311_v40 = vld [vmem:[%s2000_s19 + $0xe8] sm:$0xff]  ;;  %v297_v41 = vld [vmem:[%s2000_s19 + $0x78] sm:$0xff]  ;;  %1905 = vmatpush3.bf16.msra.mxu0 %v1902_v49 }
  0x1a   : > { %1729 = vmatmul.mubr.msk.f32.gmra.mrb[4].mxu0 %vm325_vm0, %v287_v21  ;;  %v312_v42 = vld [vmem:[%s2000_s19 + $0xf0] sm:$0xff]  ;;  %v313_v43 = vld [vmem:[%s2000_s19 + $0xf8] sm:$0xff] }
  0x1b   : > { %1731 = vmatprep.mubr.msk.f32.mxu0 %vm325_vm0, %v288_v23  ;;  %1753 = vmatmul.mubr.msk.f32.gmra.mrb[4].mxu1 %vm325_vm0, %v303_v24 }
  0x1c   : > { %1755 = vmatprep.mubr.msk.f32.mxu1 %vm325_vm0, %v304_v26 }
  0x1e   : > { %1732 = vmatmul.mubr.msk.f32.gmra.mrb[6].mxu0 %vm325_vm0, %v289_v25 }
  0x1f   : > { %1734 = vmatprep.mubr.msk.f32.mxu0 %vm325_vm0, %v290_v27  ;;  %1756 = vmatmul.mubr.msk.f32.gmra.mrb[6].mxu1 %vm325_vm0, %v305_v28 }
  0x20   : > { %1758 = vmatprep.mubr.msk.f32.mxu1 %vm325_vm0, %v306_v30 }
  0x22   : > { %1735 = vmatmul.mubr.msk.f32.gmra.mrb[8].mxu0 %vm325_vm0, %v291_v29 }
  0x23   : > { %1737 = vmatprep.mubr.msk.f32.mxu0 %vm325_vm0, %v292_v31  ;;  %1759 = vmatmul.mubr.msk.f32.gmra.mrb[8].mxu1 %vm325_vm0, %v307_v32 }
  0x24   : > { %1761 = vmatprep.mubr.msk.f32.mxu1 %vm325_vm0, %v308_v34 }
  0x26   : > { %1738 = vmatmul.mubr.msk.f32.gmra.mrb[10].mxu0 %vm325_vm0, %v293_v33 }
  0x27   : > { %1740 = vmatprep.mubr.msk.f32.mxu0 %vm325_vm0, %v294_v35  ;;  %1762 = vmatmul.mubr.msk.f32.gmra.mrb[10].mxu1 %vm325_vm0, %v309_v36 }
  0x28   : > { %1764 = vmatprep.mubr.msk.f32.mxu1 %vm325_vm0, %v310_v38 }
  0x2a   : > { %1741 = vmatmul.mubr.msk.f32.gmra.mrb[12].mxu0 %vm325_vm0, %v295_v37 }
  0x2b   : > { %1743 = vmatprep.mubr.msk.f32.mxu0 %vm325_vm0, %v296_v39  ;;  %1765 = vmatmul.mubr.msk.f32.gmra.mrb[12].mxu1 %vm325_vm0, %v311_v40 }
  0x2c   : > { %1767 = vmatprep.mubr.msk.f32.mxu1 %vm325_vm0, %v312_v42 }
  0x2e   : > { %1744 = vmatmul.mubr.msk.f32.gmra.mrb[14].mxu0 %vm325_vm0, %v297_v41 }
  0x2f   : > { %1768 = vmatmul.mubr.msk.f32.gmra.mrb[14].mxu1 %vm325_vm0, %v313_v43 }
  0xe5   : > { %v1724_v51 = vpop.f32.mrb[0].mxu0 }
  0xe6   : > { %v494_v52 = vadd.f32 %v1724_v51, %v2087_v50  ;;  %v488_v53 = vpop.f32.mrb[1].mxu0  ;;  %v2091_v55 = vpop.f32.mrb[0].mxu1 }
  0xe7   : > { %v489_v54 = vadd.f32 %v2087_v50, %v488_v53  ;;  %v568_v58 = vpop.f32.mrb[1].mxu1 }
  0xe8   : > { %v648_v59 = vmax.f32 %v494_v52, 0.0  ;;  %v569_v42 = vadd.f32 %v2087_v50, %v568_v58 }
  0xe9   : > { %v647_v56 = vmax.f32 %v489_v54, 0.0  ;;  %v1727_v57 = vpop.f32.mrb[2].mxu0 }
  0xea   : > { %v504_v60 = vadd.f32 %v1727_v57, %v2087_v50  ;;  %v498_v61 = vpop.f32.mrb[3].mxu0  ;;  %v2097_v63 = vpop.f32.mrb[2].mxu1  ;;  %v663_v51 = vmax.f32 %v569_v42, 0.0 }
  0xeb   : > { %v499_v62 = vadd.f32 %v2087_v50, %v498_v61  ;;  %1778 = vmatprep.mubr.msk.f32.mxu1 %vm325_vm0, %v647_v56  ;;  %v578_v2 = vpop.f32.mrb[3].mxu1  ;;  %v574_v56 = vadd.f32 %v2091_v55, %v2087_v50 }
  0xec   : > { %1779 = vmatmul.mubr.msk.f32.vlgmr.msra.gmra.mrb[16].mxu1 %vm325_vm0, %v648_v59  ;;  %v650_v3 = vmax.f32 %v504_v60, 0.0  ;;  %v579_v52 = vadd.f32 %v2087_v50, %v578_v2  ;;  %v584_v60 = vadd.f32 %v2097_v63, %v2087_v50 }
  0xed   : > { %v649_v0 = vmax.f32 %v499_v62, 0.0  ;;  %v1730_v1 = vpop.f32.mrb[4].mxu0  ;;  %v664_v59 = vmax.f32 %v574_v56, 0.0 }
  0xee   : > { %v514_v4 = vadd.f32 %v1730_v1, %v2087_v50  ;;  %v508_v5 = vpop.f32.mrb[5].mxu0  ;;  %v2103_v7 = vpop.f32.mrb[4].mxu1  ;;  %v665_v57 = vmax.f32 %v579_v52, 0.0  ;;  %v666_v62 = vmax.f32 %v584_v60, 0.0 }
  0xef   : > { %v509_v6 = vadd.f32 %v2087_v50, %v508_v5  ;;  %1781 = vmatprep.mubr.msk.f32.mxu1 %vm325_vm0, %v649_v0  ;;  %v588_v10 = vpop.f32.mrb[5].mxu1  ;;  %v594_v0 = vadd.f32 %v2103_v7, %v2087_v50 }
  0xf0   : > { %1782 = vmatmul.mubr.msk.f32.gmra.mrb[18].mxu1 %vm325_vm0, %v650_v3  ;;  %v652_v11 = vmax.f32 %v514_v4, 0.0  ;;  %v589_v58 = vadd.f32 %v2087_v50, %v588_v10 }
  0xf1   : > { %v651_v8 = vmax.f32 %v509_v6, 0.0  ;;  %v1733_v9 = vpop.f32.mrb[6].mxu0  ;;  %v668_v3 = vmax.f32 %v594_v0, 0.0 }
  0xf2   : > { %v524_v12 = vadd.f32 %v1733_v9, %v2087_v50  ;;  %v518_v13 = vpop.f32.mrb[7].mxu0  ;;  %v2109_v15 = vpop.f32.mrb[6].mxu1  ;;  %v667_v61 = vmax.f32 %v589_v58, 0.0 }
  0xf3   : > { %v519_v14 = vadd.f32 %v2087_v50, %v518_v13  ;;  %1784 = vmatprep.mubr.msk.f32.mxu1 %vm325_vm0, %v651_v8  ;;  %v598_v18 = vpop.f32.mrb[7].mxu1  ;;  %v604_v63 = vadd.f32 %v2109_v15, %v2087_v50 }
  0xf4   : > { %1785 = vmatmul.mubr.msk.f32.gmra.mrb[20].mxu1 %vm325_vm0, %v652_v11  ;;  %v654_v19 = vmax.f32 %v524_v12, 0.0  ;;  %v599_v55 = vadd.f32 %v2087_v50, %v598_v18 }
  0xf5   : > { %v653_v16 = vmax.f32 %v519_v14, 0.0  ;;  %v1736_v17 = vpop.f32.mrb[8].mxu0  ;;  %v670_v6 = vmax.f32 %v604_v63, 0.0 }
  0xf6   : > { %v534_v20 = vadd.f32 %v1736_v17, %v2087_v50  ;;  %v528_v21 = vpop.f32.mrb[9].mxu0  ;;  %v1760_v23 = vpop.f32.mrb[8].mxu1  ;;  %v669_v1 = vmax.f32 %v599_v55, 0.0 }
  0xf7   : > { %v529_v22 = vadd.f32 %v2087_v50, %v528_v21  ;;  %1787 = vmatprep.mubr.msk.f32.mxu1 %vm325_vm0, %v653_v16  ;;  %v608_v26 = vpop.f32.mrb[9].mxu1  ;;  %v614_v7 = vadd.f32 %v1760_v23, %v2087_v50 }
  0xf8   : > { %1788 = vmatmul.mubr.msk.f32.gmra.mrb[22].mxu1 %vm325_vm0, %v654_v19  ;;  %v656_v27 = vmax.f32 %v534_v20, 0.0  ;;  %v609_v2 = vadd.f32 %v2087_v50, %v608_v26  ;;  %v2168_v20 = vld [vmem:[%s2349_s4] ss:$0 sm:$0xff] }
  0xf9   : > { %v655_v24 = vmax.f32 %v529_v22, 0.0  ;;  %v1739_v25 = vpop.f32.mrb[10].mxu0  ;;  %v672_v10 = vmax.f32 %v614_v7, 0.0 }
  0xfa   : > { %v544_v28 = vadd.f32 %v1739_v25, %v2087_v50  ;;  %v538_v29 = vpop.f32.mrb[11].mxu0  ;;  %v1763_v31 = vpop.f32.mrb[10].mxu1  ;;  %v671_v4 = vmax.f32 %v609_v2, 0.0 }
  0xfb   : > { %v539_v30 = vadd.f32 %v2087_v50, %v538_v29  ;;  %1790 = vmatprep.mubr.msk.f32.mxu1 %vm325_vm0, %v655_v24  ;;  %v618_v34 = vpop.f32.mrb[11].mxu1  ;;  %v624_v11 = vadd.f32 %v1763_v31, %v2087_v50 }
  0xfc   : > { %1791 = vmatmul.mubr.msk.f32.gmra.mrb[24].mxu1 %vm325_vm0, %v656_v27  ;;  %v658_v35 = vmax.f32 %v544_v28, 0.0  ;;  %v619_v5 = vadd.f32 %v2087_v50, %v618_v34 }
  0xfd   : > { %v657_v32 = vmax.f32 %v539_v30, 0.0  ;;  %v1742_v33 = vpop.f32.mrb[12].mxu0  ;;  %v674_v14 = vmax.f32 %v624_v11, 0.0 }
  0xfe   : > { %v554_v36 = vadd.f32 %v1742_v33, %v2087_v50  ;;  %v548_v37 = vpop.f32.mrb[13].mxu0  ;;  %v1766_v39 = vpop.f32.mrb[12].mxu1  ;;  %v673_v8 = vmax.f32 %v619_v5, 0.0 }
  0xff   : > { %v549_v38 = vadd.f32 %v2087_v50, %v548_v37  ;;  %1793 = vmatprep.mubr.msk.f32.mxu1 %vm325_vm0, %v657_v32  ;;  %v628_v43 = vpop.f32.mrb[13].mxu1  ;;  %v634_v15 = vadd.f32 %v1766_v39, %v2087_v50 }
 0x100   : > { %1794 = vmatmul.mubr.msk.f32.gmra.mrb[26].mxu1 %vm325_vm0, %v658_v35  ;;  %v660_v44 = vmax.f32 %v554_v36, 0.0  ;;  %v629_v9 = vadd.f32 %v2087_v50, %v628_v43 }
 0x101   : > { %v659_v40 = vmax.f32 %v549_v38, 0.0  ;;  %v1745_v41 = vpop.f32.mrb[14].mxu0  ;;  %v676_v17 = vmax.f32 %v634_v15, 0.0 }
 0x102   : > { %v564_v45 = vadd.f32 %v1745_v41, %v2087_v50  ;;  %v558_v46 = vpop.f32.mrb[15].mxu0  ;;  %v1769_v48 = vpop.f32.mrb[14].mxu1  ;;  %v675_v12 = vmax.f32 %v629_v9, 0.0 }
 0x103   : > { %v559_v47 = vadd.f32 %v2087_v50, %v558_v46  ;;  %1796 = vmatprep.mubr.msk.f32.mxu1 %vm325_vm0, %v659_v40  ;;  %v638_v53 = vpop.f32.mrb[15].mxu1  ;;  %v644_v18 = vadd.f32 %v1769_v48, %v2087_v50 }
 0x104   : > { %1797 = vmatmul.mubr.msk.f32.gmra.mrb[28].mxu1 %vm325_vm0, %v660_v44  ;;  %v662_v54 = vmax.f32 %v564_v45, 0.0  ;;  %v639_v13 = vadd.f32 %v2087_v50, %v638_v53 }
 0x105   : > { %v661_v49 = vmax.f32 %v559_v47, 0.0  ;;  %v678_v19 = vmax.f32 %v644_v18, 0.0 }
 0x106   : > { %v677_v16 = vmax.f32 %v639_v13, 0.0 }
 0x107   : > { %1799 = vmatprep.mubr.msk.f32.mxu1 %vm325_vm0, %v661_v49 }
 0x108   : > { %1800 = vmatmul.mubr.msk.f32.gmra.mrb[30].mxu1 %vm325_vm0, %v662_v54 }
 0x109   : > { %1802 = vmatprep.mubr.msk.f32.mxu1 %vm325_vm0, %v663_v51 }
 0x10c   : > { %1803 = vmatmul.mubr.msk.f32.gmra.mrb[32].mxu1 %vm325_vm0, %v664_v59 }
 0x10d   : > { %1805 = vmatprep.mubr.msk.f32.mxu1 %vm325_vm0, %v665_v57 }
 0x110   : > { %1806 = vmatmul.mubr.msk.f32.gmra.mrb[34].mxu1 %vm325_vm0, %v666_v62 }
 0x111   : > { %1808 = vmatprep.mubr.msk.f32.mxu1 %vm325_vm0, %v667_v61 }
 0x114   : > { %1809 = vmatmul.mubr.msk.f32.gmra.mrb[36].mxu1 %vm325_vm0, %v668_v3 }
 0x115   : > { %1811 = vmatprep.mubr.msk.f32.mxu1 %vm325_vm0, %v669_v1 }
 0x118   : > { %1812 = vmatmul.mubr.msk.f32.gmra.mrb[38].mxu1 %vm325_vm0, %v670_v6 }
 0x119   : > { %1814 = vmatprep.mubr.msk.f32.mxu1 %vm325_vm0, %v671_v4 }
 0x11c   : > { %1815 = vmatmul.mubr.msk.f32.gmra.mrb[40].mxu1 %vm325_vm0, %v672_v10 }
 0x11d   : > { %1817 = vmatprep.mubr.msk.f32.mxu1 %vm325_vm0, %v673_v8 }
 0x120   : > { %1818 = vmatmul.mubr.msk.f32.gmra.mrb[42].mxu1 %vm325_vm0, %v674_v14 }
 0x121   : > { %1820 = vmatprep.mubr.msk.f32.mxu1 %vm325_vm0, %v675_v12 }
 0x124   : > { %1821 = vmatmul.mubr.msk.f32.gmra.mrb[44].mxu1 %vm325_vm0, %v676_v17 }
 0x125   : > { %1823 = vmatprep.mubr.msk.f32.mxu1 %vm325_vm0, %v677_v16 }
 0x128   : > { %1824 = vmatmul.mubr.msk.f32.gmra.mrb[46].mxu1 %vm325_vm0, %v678_v19 }
 0x1bf   : > { %v1780_v21 = vpop.f32.mrb[16].mxu1 }
 0x1c0   : > { %v858_v22 = vadd.f32 %v1780_v21, %v2168_v20  ;;  %v852_v23 = vpop.f32.mrb[17].mxu1 }
 0x1c1   : > { %v853_v24 = vadd.f32 %v2168_v20, %v852_v23 }
 0x1c2   : > { %v1012_v26 = vmax.f32 %v858_v22, 0.0 }
 0x1c3   : > { %v1011_v25 = vmax.f32 %v853_v24, 0.0  ;;  %v1783_v50 = vpop.f32.mrb[18].mxu1 }
 0x1c4   : > { %v868_v27 = vadd.f32 %v1783_v50, %v2168_v20  ;;  %v862_v28 = vpop.f32.mrb[19].mxu1 }
 0x1c5   : > { %v863_v29 = vadd.f32 %v2168_v20, %v862_v28  ;;  %1834 = vmatprep.mubr.msk.f32.mxu0 %vm325_vm0, %v1011_v25 }
 0x1c6   : > { %1835 = vmatmul.mubr.msk.f32.vlgmr.msra.gmra.mrb[16].mxu0 %vm325_vm0, %v1012_v26  ;;  %v1014_v32 = vmax.f32 %v868_v27, 0.0 }
 0x1c7   : > { %v1013_v30 = vmax.f32 %v863_v29, 0.0  ;;  %v1786_v31 = vpop.f32.mrb[20].mxu1 }
 0x1c8   : > { %v878_v33 = vadd.f32 %v1786_v31, %v2168_v20  ;;  %v872_v34 = vpop.f32.mrb[21].mxu1 }
 0x1c9   : > { %v873_v35 = vadd.f32 %v2168_v20, %v872_v34  ;;  %1837 = vmatprep.mubr.msk.f32.mxu0 %vm325_vm0, %v1013_v30 }
 0x1ca   : > { %1838 = vmatmul.mubr.msk.f32.gmra.mrb[18].mxu0 %vm325_vm0, %v1014_v32  ;;  %v1016_v38 = vmax.f32 %v878_v33, 0.0 }
 0x1cb   : > { %v1015_v36 = vmax.f32 %v873_v35, 0.0  ;;  %v1789_v37 = vpop.f32.mrb[22].mxu1 }
 0x1cc   : > { %v888_v39 = vadd.f32 %v1789_v37, %v2168_v20  ;;  %v882_v40 = vpop.f32.mrb[23].mxu1 }
 0x1cd   : > { %v883_v41 = vadd.f32 %v2168_v20, %v882_v40  ;;  %1840 = vmatprep.mubr.msk.f32.mxu0 %vm325_vm0, %v1015_v36 }
 0x1ce   : > { %1841 = vmatmul.mubr.msk.f32.gmra.mrb[20].mxu0 %vm325_vm0, %v1016_v38  ;;  %v1018_v44 = vmax.f32 %v888_v39, 0.0 }
 0x1cf   : > { %v1017_v42 = vmax.f32 %v883_v41, 0.0  ;;  %v1792_v43 = vpop.f32.mrb[24].mxu1 }
 0x1d0   : > { %v898_v45 = vadd.f32 %v1792_v43, %v2168_v20  ;;  %v892_v46 = vpop.f32.mrb[25].mxu1 }
 0x1d1   : > { %v893_v47 = vadd.f32 %v2168_v20, %v892_v46  ;;  %1843 = vmatprep.mubr.msk.f32.mxu0 %vm325_vm0, %v1017_v42 }
 0x1d2   : > { %1844 = vmatmul.mubr.msk.f32.gmra.mrb[22].mxu0 %vm325_vm0, %v1018_v44  ;;  %v1020_v51 = vmax.f32 %v898_v45, 0.0 }
 0x1d3   : > { %v1019_v48 = vmax.f32 %v893_v47, 0.0  ;;  %v1795_v49 = vpop.f32.mrb[26].mxu1 }
 0x1d4   : > { %v908_v52 = vadd.f32 %v1795_v49, %v2168_v20  ;;  %v902_v53 = vpop.f32.mrb[27].mxu1 }
 0x1d5   : > { %v903_v54 = vadd.f32 %v2168_v20, %v902_v53  ;;  %1846 = vmatprep.mubr.msk.f32.mxu0 %vm325_vm0, %v1019_v48 }
 0x1d6   : > { %1847 = vmatmul.mubr.msk.f32.gmra.mrb[24].mxu0 %vm325_vm0, %v1020_v51  ;;  %v1022_v58 = vmax.f32 %v908_v52, 0.0 }
 0x1d7   : > { %v1021_v56 = vmax.f32 %v903_v54, 0.0  ;;  %v1798_v57 = vpop.f32.mrb[28].mxu1  ;;  %v2237_v54 = vld [vmem:[%s2351_s6] ss:$0 sm:$0xff] }
 0x1d8   : > { %v918_v59 = vadd.f32 %v1798_v57, %v2168_v20  ;;  %v912_v60 = vpop.f32.mrb[29].mxu1 }
 0x1d9   : > { %v913_v61 = vadd.f32 %v2168_v20, %v912_v60  ;;  %1849 = vmatprep.mubr.msk.f32.mxu0 %vm325_vm0, %v1021_v56 }
 0x1da   : > { %1850 = vmatmul.mubr.msk.f32.gmra.mrb[26].mxu0 %vm325_vm0, %v1022_v58  ;;  %v1024_v0 = vmax.f32 %v918_v59, 0.0 }
 0x1db   : > { %v1023_v55 = vmax.f32 %v913_v61, 0.0  ;;  %v1801_v62 = vpop.f32.mrb[30].mxu1 }
 0x1dc   : > { %v928_v1 = vadd.f32 %v1801_v62, %v2168_v20  ;;  %v922_v2 = vpop.f32.mrb[31].mxu1 }
 0x1dd   : > { %v923_v3 = vadd.f32 %v2168_v20, %v922_v2  ;;  %1852 = vmatprep.mubr.msk.f32.mxu0 %vm325_vm0, %v1023_v55 }
 0x1de   : > { %1853 = vmatmul.mubr.msk.f32.gmra.mrb[28].mxu0 %vm325_vm0, %v1024_v0  ;;  %v1026_v5 = vmax.f32 %v928_v1, 0.0 }
 0x1df   : > { %v1025_v63 = vmax.f32 %v923_v3, 0.0  ;;  %v1804_v4 = vpop.f32.mrb[32].mxu1 }
 0x1e0   : > { %v938_v6 = vadd.f32 %v1804_v4, %v2168_v20  ;;  %v932_v7 = vpop.f32.mrb[33].mxu1 }
 0x1e1   : > { %v933_v8 = vadd.f32 %v2168_v20, %v932_v7  ;;  %1855 = vmatprep.mubr.msk.f32.mxu0 %vm325_vm0, %v1025_v63 }
 0x1e2   : > { %1856 = vmatmul.mubr.msk.f32.gmra.mrb[30].mxu0 %vm325_vm0, %v1026_v5  ;;  %v1028_v11 = vmax.f32 %v938_v6, 0.0 }
 0x1e3   : > { %v1027_v9 = vmax.f32 %v933_v8, 0.0  ;;  %v1807_v10 = vpop.f32.mrb[34].mxu1 }
 0x1e4   : > { %v948_v12 = vadd.f32 %v1807_v10, %v2168_v20  ;;  %v942_v13 = vpop.f32.mrb[35].mxu1 }
 0x1e5   : > { %v943_v14 = vadd.f32 %v2168_v20, %v942_v13  ;;  %1858 = vmatprep.mubr.msk.f32.mxu0 %vm325_vm0, %v1027_v9 }
 0x1e6   : > { %1859 = vmatmul.mubr.msk.f32.gmra.mrb[32].mxu0 %vm325_vm0, %v1028_v11  ;;  %v1030_v17 = vmax.f32 %v948_v12, 0.0 }
 0x1e7   : > { %v1029_v15 = vmax.f32 %v943_v14, 0.0  ;;  %v1810_v16 = vpop.f32.mrb[36].mxu1 }
 0x1e8   : > { %v958_v18 = vadd.f32 %v1810_v16, %v2168_v20  ;;  %v952_v19 = vpop.f32.mrb[37].mxu1 }
 0x1e9   : > { %v953_v21 = vadd.f32 %v2168_v20, %v952_v19  ;;  %1861 = vmatprep.mubr.msk.f32.mxu0 %vm325_vm0, %v1029_v15 }
 0x1ea   : > { %1862 = vmatmul.mubr.msk.f32.gmra.mrb[34].mxu0 %vm325_vm0, %v1030_v17  ;;  %v1032_v24 = vmax.f32 %v958_v18, 0.0 }
 0x1eb   : > { %v1031_v22 = vmax.f32 %v953_v21, 0.0  ;;  %v1813_v23 = vpop.f32.mrb[38].mxu1 }
 0x1ec   : > { %v968_v25 = vadd.f32 %v1813_v23, %v2168_v20  ;;  %v962_v50 = vpop.f32.mrb[39].mxu1 }
 0x1ed   : > { %v963_v26 = vadd.f32 %v2168_v20, %v962_v50  ;;  %1864 = vmatprep.mubr.msk.f32.mxu0 %vm325_vm0, %v1031_v22 }
 0x1ee   : > { %1865 = vmatmul.mubr.msk.f32.gmra.mrb[36].mxu0 %vm325_vm0, %v1032_v24  ;;  %v1034_v29 = vmax.f32 %v968_v25, 0.0 }
 0x1ef   : > { %v1033_v27 = vmax.f32 %v963_v26, 0.0  ;;  %v1816_v28 = vpop.f32.mrb[40].mxu1 }
 0x1f0   : > { %v978_v30 = vadd.f32 %v1816_v28, %v2168_v20  ;;  %v972_v31 = vpop.f32.mrb[41].mxu1 }
 0x1f1   : > { %v973_v32 = vadd.f32 %v2168_v20, %v972_v31  ;;  %1867 = vmatprep.mubr.msk.f32.mxu0 %vm325_vm0, %v1033_v27 }
 0x1f2   : > { %1868 = vmatmul.mubr.msk.f32.gmra.mrb[38].mxu0 %vm325_vm0, %v1034_v29  ;;  %v1036_v35 = vmax.f32 %v978_v30, 0.0 }
 0x1f3   : > { %v1035_v33 = vmax.f32 %v973_v32, 0.0  ;;  %v1819_v34 = vpop.f32.mrb[42].mxu1 }
 0x1f4   : > { %v988_v36 = vadd.f32 %v1819_v34, %v2168_v20  ;;  %v982_v37 = vpop.f32.mrb[43].mxu1 }
 0x1f5   : > { %v983_v38 = vadd.f32 %v2168_v20, %v982_v37  ;;  %1870 = vmatprep.mubr.msk.f32.mxu0 %vm325_vm0, %v1035_v33 }
 0x1f6   : > { %1871 = vmatmul.mubr.msk.f32.gmra.mrb[40].mxu0 %vm325_vm0, %v1036_v35  ;;  %v1038_v41 = vmax.f32 %v988_v36, 0.0 }
 0x1f7   : > { %v1037_v39 = vmax.f32 %v983_v38, 0.0  ;;  %v1822_v40 = vpop.f32.mrb[44].mxu1 }
 0x1f8   : > { %v998_v42 = vadd.f32 %v1822_v40, %v2168_v20  ;;  %v992_v43 = vpop.f32.mrb[45].mxu1 }
 0x1f9   : > { %v993_v44 = vadd.f32 %v2168_v20, %v992_v43  ;;  %1873 = vmatprep.mubr.msk.f32.mxu0 %vm325_vm0, %v1037_v39 }
 0x1fa   : > { %1874 = vmatmul.mubr.msk.f32.gmra.mrb[42].mxu0 %vm325_vm0, %v1038_v41  ;;  %v1040_v47 = vmax.f32 %v998_v42, 0.0 }
 0x1fb   : > { %v1039_v45 = vmax.f32 %v993_v44, 0.0  ;;  %v1825_v46 = vpop.f32.mrb[46].mxu1 }
 0x1fc   : > { %v1008_v48 = vadd.f32 %v1825_v46, %v2168_v20  ;;  %v1002_v49 = vpop.f32.mrb[47].mxu1 }
 0x1fd   : > { %v1003_v51 = vadd.f32 %v2168_v20, %v1002_v49  ;;  %1876 = vmatprep.mubr.msk.f32.mxu0 %vm325_vm0, %v1039_v45 }
 0x1fe   : > { %1877 = vmatmul.mubr.msk.f32.gmra.mrb[44].mxu0 %vm325_vm0, %v1040_v47  ;;  %v1042_v53 = vmax.f32 %v1008_v48, 0.0 }
 0x1ff   : > { %v1041_v52 = vmax.f32 %v1003_v51, 0.0 }
 0x201   : > { %1879 = vmatprep.mubr.msk.f32.mxu0 %vm325_vm0, %v1041_v52 }
 0x202   : > { %1880 = vmatmul.mubr.msk.f32.gmra.mrb[46].mxu0 %vm325_vm0, %v1042_v53 }
 0x299   : > { %v1836_v56 = vpop.f32.mrb[16].mxu0 }
 0x29a   : > { %v1222_v57 = vadd.f32 %v1836_v56, %v2237_v54  ;;  %v1216_v58 = vpop.f32.mrb[17].mxu0 }
 0x29b   : > { %v1217_v20 = vadd.f32 %v2237_v54, %v1216_v58 }
 0x29c   : > { %v1376_v59 = vmax.f32 %v1222_v57, 0.0 }
 0x29d   : > { %v1375_v60 = vmax.f32 %v1217_v20, 0.0  ;;  %v1839_v61 = vpop.f32.mrb[18].mxu0 }
 0x29e   : > { %1409 = vst.msk [vmem:[%s2245_s20 + $0x8] sm:$0xff] %vm1407_vm1, %v1376_v59  ;;  %v1232_v55 = vadd.f32 %v1839_v61, %v2237_v54  ;;  %v1226_v62 = vpop.f32.mrb[19].mxu0 }
 0x29f   : > { %1408 = vst.msk [vmem:[%s2245_s20] sm:$0xff] %vm1407_vm1, %v1375_v60  ;;  %v1227_v0 = vadd.f32 %v2237_v54, %v1226_v62 }
 0x2a0   : > { %v1378_v1 = vmax.f32 %v1232_v55, 0.0 }
 0x2a1   : > { %v1377_v2 = vmax.f32 %v1227_v0, 0.0  ;;  %v1842_v3 = vpop.f32.mrb[20].mxu0 }
 0x2a2   : > { %1411 = vst.msk [vmem:[%s2245_s20 + $0x18] sm:$0xff] %vm1407_vm1, %v1378_v1  ;;  %v1242_v63 = vadd.f32 %v1842_v3, %v2237_v54  ;;  %v1236_v4 = vpop.f32.mrb[21].mxu0 }
 0x2a3   : > { %1410 = vst.msk [vmem:[%s2245_s20 + $0x10] sm:$0xff] %vm1407_vm1, %v1377_v2  ;;  %v1237_v5 = vadd.f32 %v2237_v54, %v1236_v4 }
 0x2a4   : > { %v1380_v6 = vmax.f32 %v1242_v63, 0.0 }
 0x2a5   : > { %v1379_v7 = vmax.f32 %v1237_v5, 0.0  ;;  %v1845_v8 = vpop.f32.mrb[22].mxu0 }
 0x2a6   : > { %1413 = vst.msk [vmem:[%s2245_s20 + $0x28] sm:$0xff] %vm1407_vm1, %v1380_v6  ;;  %v1252_v9 = vadd.f32 %v1845_v8, %v2237_v54  ;;  %v1246_v10 = vpop.f32.mrb[23].mxu0 }
 0x2a7   : > { %1412 = vst.msk [vmem:[%s2245_s20 + $0x20] sm:$0xff] %vm1407_vm1, %v1379_v7  ;;  %v1247_v11 = vadd.f32 %v2237_v54, %v1246_v10 }
 0x2a8   : > { %v1382_v12 = vmax.f32 %v1252_v9, 0.0 }
 0x2a9   : > { %v1381_v13 = vmax.f32 %v1247_v11, 0.0  ;;  %v1848_v14 = vpop.f32.mrb[24].mxu0 }
 0x2aa   : > { %1415 = vst.msk [vmem:[%s2245_s20 + $0x38] sm:$0xff] %vm1407_vm1, %v1382_v12  ;;  %v1262_v15 = vadd.f32 %v1848_v14, %v2237_v54  ;;  %v1256_v16 = vpop.f32.mrb[25].mxu0 }
 0x2ab   : > { %1414 = vst.msk [vmem:[%s2245_s20 + $0x30] sm:$0xff] %vm1407_vm1, %v1381_v13  ;;  %v1257_v17 = vadd.f32 %v2237_v54, %v1256_v16 }
 0x2ac   : > { %v1384_v18 = vmax.f32 %v1262_v15, 0.0 }
 0x2ad   : > { %v1383_v19 = vmax.f32 %v1257_v17, 0.0  ;;  %v1851_v21 = vpop.f32.mrb[26].mxu0 }
 0x2ae   : > { %1417 = vst.msk [vmem:[%s2245_s20 + $0x48] sm:$0xff] %vm1407_vm1, %v1384_v18  ;;  %v1272_v22 = vadd.f32 %v1851_v21, %v2237_v54  ;;  %v1266_v23 = vpop.f32.mrb[27].mxu0 }
 0x2af   : > { %1416 = vst.msk [vmem:[%s2245_s20 + $0x40] sm:$0xff] %vm1407_vm1, %v1383_v19  ;;  %v1267_v24 = vadd.f32 %v2237_v54, %v1266_v23 }
 0x2b0   : > { %v1386_v25 = vmax.f32 %v1272_v22, 0.0 }
 0x2b1   : > { %v1385_v50 = vmax.f32 %v1267_v24, 0.0  ;;  %v1854_v26 = vpop.f32.mrb[28].mxu0 }
 0x2b2   : > { %1419 = vst.msk [vmem:[%s2245_s20 + $0x58] sm:$0xff] %vm1407_vm1, %v1386_v25  ;;  %v1282_v27 = vadd.f32 %v1854_v26, %v2237_v54  ;;  %v1276_v28 = vpop.f32.mrb[29].mxu0 }
 0x2b3   : > { %1418 = vst.msk [vmem:[%s2245_s20 + $0x50] sm:$0xff] %vm1407_vm1, %v1385_v50  ;;  %v1277_v29 = vadd.f32 %v2237_v54, %v1276_v28 }
 0x2b4   : > { %v1388_v30 = vmax.f32 %v1282_v27, 0.0 }
 0x2b5   : > { %v1387_v31 = vmax.f32 %v1277_v29, 0.0  ;;  %v1857_v32 = vpop.f32.mrb[30].mxu0 }
 0x2b6   : > { %1421 = vst.msk [vmem:[%s2245_s20 + $0x68] sm:$0xff] %vm1407_vm1, %v1388_v30  ;;  %v1292_v33 = vadd.f32 %v1857_v32, %v2237_v54  ;;  %v1286_v34 = vpop.f32.mrb[31].mxu0 }
 0x2b7   : > { %1420 = vst.msk [vmem:[%s2245_s20 + $0x60] sm:$0xff] %vm1407_vm1, %v1387_v31  ;;  %v1287_v35 = vadd.f32 %v2237_v54, %v1286_v34 }
 0x2b8   : > { %v1390_v36 = vmax.f32 %v1292_v33, 0.0 }
 0x2b9   : > { %v1389_v37 = vmax.f32 %v1287_v35, 0.0  ;;  %v1860_v38 = vpop.f32.mrb[32].mxu0 }
 0x2ba   : > { %1423 = vst.msk [vmem:[%s2245_s20 + $0x78] sm:$0xff] %vm1407_vm1, %v1390_v36  ;;  %v1302_v39 = vadd.f32 %v1860_v38, %v2237_v54  ;;  %v1296_v40 = vpop.f32.mrb[33].mxu0 }
 0x2bb   : > { %1422 = vst.msk [vmem:[%s2245_s20 + $0x70] sm:$0xff] %vm1407_vm1, %v1389_v37  ;;  %v1297_v41 = vadd.f32 %v2237_v54, %v1296_v40 }
 0x2bc   : > { %v1392_v42 = vmax.f32 %v1302_v39, 0.0 }
 0x2bd   : > { %v1391_v43 = vmax.f32 %v1297_v41, 0.0  ;;  %v1863_v44 = vpop.f32.mrb[34].mxu0 }
 0x2be   : > { %1425 = vst.msk [vmem:[%s2245_s20 + $0x88] sm:$0xff] %vm1407_vm1, %v1392_v42  ;;  %v1312_v45 = vadd.f32 %v1863_v44, %v2237_v54  ;;  %v1306_v46 = vpop.f32.mrb[35].mxu0 }
 0x2bf   : > { %1424 = vst.msk [vmem:[%s2245_s20 + $0x80] sm:$0xff] %vm1407_vm1, %v1391_v43  ;;  %v1307_v47 = vadd.f32 %v2237_v54, %v1306_v46 }
 0x2c0   : > { %v1394_v48 = vmax.f32 %v1312_v45, 0.0 }
 0x2c1   : > { %v1393_v49 = vmax.f32 %v1307_v47, 0.0  ;;  %v1866_v51 = vpop.f32.mrb[36].mxu0 }
 0x2c2   : > { %1427 = vst.msk [vmem:[%s2245_s20 + $0x98] sm:$0xff] %vm1407_vm1, %v1394_v48  ;;  %v1322_v52 = vadd.f32 %v1866_v51, %v2237_v54  ;;  %v1316_v53 = vpop.f32.mrb[37].mxu0 }
 0x2c3   : > { %1426 = vst.msk [vmem:[%s2245_s20 + $0x90] sm:$0xff] %vm1407_vm1, %v1393_v49  ;;  %v1317_v56 = vadd.f32 %v2237_v54, %v1316_v53 }
 0x2c4   : > { %v1396_v57 = vmax.f32 %v1322_v52, 0.0 }
 0x2c5   : > { %v1395_v58 = vmax.f32 %v1317_v56, 0.0  ;;  %v1869_v20 = vpop.f32.mrb[38].mxu0 }
 0x2c6   : > { %1429 = vst.msk [vmem:[%s2245_s20 + $0xa8] sm:$0xff] %vm1407_vm1, %v1396_v57  ;;  %v1332_v59 = vadd.f32 %v1869_v20, %v2237_v54  ;;  %v1326_v60 = vpop.f32.mrb[39].mxu0 }
 0x2c7   : > { %1428 = vst.msk [vmem:[%s2245_s20 + $0xa0] sm:$0xff] %vm1407_vm1, %v1395_v58  ;;  %v1327_v61 = vadd.f32 %v2237_v54, %v1326_v60 }
 0x2c8   : > { %v1398_v55 = vmax.f32 %v1332_v59, 0.0 }
 0x2c9   : > { %v1397_v62 = vmax.f32 %v1327_v61, 0.0  ;;  %v1872_v0 = vpop.f32.mrb[40].mxu0 }
 0x2ca   : > { %1431 = vst.msk [vmem:[%s2245_s20 + $0xb8] sm:$0xff] %vm1407_vm1, %v1398_v55  ;;  %v1342_v1 = vadd.f32 %v1872_v0, %v2237_v54  ;;  %v1336_v2 = vpop.f32.mrb[41].mxu0 }
 0x2cb   : > { %1430 = vst.msk [vmem:[%s2245_s20 + $0xb0] sm:$0xff] %vm1407_vm1, %v1397_v62  ;;  %v1337_v3 = vadd.f32 %v2237_v54, %v1336_v2 }
 0x2cc   : > { %v1400_v63 = vmax.f32 %v1342_v1, 0.0 }
 0x2cd   : > { %v1399_v4 = vmax.f32 %v1337_v3, 0.0  ;;  %v1875_v5 = vpop.f32.mrb[42].mxu0 }
 0x2ce   : > { %1433 = vst.msk [vmem:[%s2245_s20 + $0xc8] sm:$0xff] %vm1407_vm1, %v1400_v63  ;;  %v1352_v6 = vadd.f32 %v1875_v5, %v2237_v54  ;;  %v1346_v7 = vpop.f32.mrb[43].mxu0 }
 0x2cf   : > { %1432 = vst.msk [vmem:[%s2245_s20 + $0xc0] sm:$0xff] %vm1407_vm1, %v1399_v4  ;;  %v1347_v8 = vadd.f32 %v2237_v54, %v1346_v7 }
 0x2d0   : > { %v1402_v9 = vmax.f32 %v1352_v6, 0.0 }
 0x2d1   : > { %v1401_v10 = vmax.f32 %v1347_v8, 0.0  ;;  %v1878_v11 = vpop.f32.mrb[44].mxu0 }
 0x2d2   : > { %1435 = vst.msk [vmem:[%s2245_s20 + $0xd8] sm:$0xff] %vm1407_vm1, %v1402_v9  ;;  %v1362_v12 = vadd.f32 %v1878_v11, %v2237_v54  ;;  %v1356_v13 = vpop.f32.mrb[45].mxu0 }
 0x2d3   : > { %1434 = vst.msk [vmem:[%s2245_s20 + $0xd0] sm:$0xff] %vm1407_vm1, %v1401_v10  ;;  %v1357_v14 = vadd.f32 %v2237_v54, %v1356_v13 }
 0x2d4   : > { %v1404_v15 = vmax.f32 %v1362_v12, 0.0 }
 0x2d5   : > { %v1403_v16 = vmax.f32 %v1357_v14, 0.0  ;;  %v1881_v17 = vpop.f32.mrb[46].mxu0 }
 0x2d6   : > { %1437 = vst.msk [vmem:[%s2245_s20 + $0xe8] sm:$0xff] %vm1407_vm1, %v1404_v15  ;;  %v1372_v18 = vadd.f32 %v1881_v17, %v2237_v54  ;;  %v1366_v19 = vpop.f32.mrb[47].mxu0 }
 0x2d7   : > { %1436 = vst.msk [vmem:[%s2245_s20 + $0xe0] sm:$0xff] %vm1407_vm1, %v1403_v16  ;;  %v1367_v21 = vadd.f32 %v2237_v54, %v1366_v19 }
 0x2d8   : > { %v1406_v22 = vmax.f32 %v1372_v18, 0.0 }
 0x2d9   : > { %v1405_v23 = vmax.f32 %v1367_v21, 0.0 }
 0x2da   : > { %1439 = vst.msk [vmem:[%s2245_s20 + $0xf8] sm:$0xff] %vm1407_vm1, %v1406_v22 }
 0x2db   : > { %1438 = vst.msk [vmem:[%s2245_s20 + $0xf0] sm:$0xff] %vm1407_vm1, %v1405_v23 }
 0x2dc PF: > { %s17_s24 = sadd.s32 1, %s1924_s24  }
 0x2dd   : > { %p14_p4 = scmp.ge.s32.totalorder %s17_s24, 4  }
 0x2df   :  { %16 = sbr.rel (!%p14_p4) target bundleno = 1 (0x1), region = 78 }

</bundles_post_ra>
